<compile_context>
chip_gen: v5e
topology: v5e:2x2
jax: 0.10.0
libtpu: 0.0.40
codegen_flags: <defaults>
</compile_context>

<pallas_src>
import math

import jax
import jax.numpy as jnp
from jax.experimental import pallas as pl
from jax.experimental.pallas import tpu as pltpu


def sinusoidal_positional_encoding(max_len, d_model, dtype=jnp.float32):
    """Precompute the [max_len, d_model] sinusoidal table (matches the PyTorch buffer)."""
    assert d_model % 2 == 0, "d_model must be even (as in the reference module)"
    position = jnp.arange(max_len, dtype=jnp.float32)[:, None]            # [L, 1]
    div_term = jnp.exp(
        jnp.arange(0, d_model, 2, dtype=jnp.float32) * (-math.log(10000.0) / d_model)
    )                                                                      # [D/2]
    angles = position * div_term                                           # [L, D/2]
    pe = jnp.zeros((max_len, d_model), dtype=jnp.float32)
    pe = pe.at[:, 0::2].set(jnp.sin(angles))
    pe = pe.at[:, 1::2].set(jnp.cos(angles))
    return pe.astype(dtype)


def _add_pe_kernel(x_ref, pe_ref, o_ref):
    # x_ref : (ts, L) block of the (packed) input        -- any float dtype
    # pe_ref: (ts, L) block of the (packed) PE table     -- cast to f32 on-chip
    # o_ref : (ts, L) output block in x's dtype
    o_ref[...] = (
        x_ref[...].astype(jnp.float32) + pe_ref[...].astype(jnp.float32)
    ).astype(o_ref.dtype)


# Lane widths tried for the flattened (rows, lanes) layout: wide multiples of 128.
_LANE_CANDIDATES = (2048, 1536, 1024, 768, 640, 512, 384, 256, 128)
# Target for the double-buffered (x-in, pe, out) working set; well under the 32 MiB
# scoped VMEM limit we set explicitly (v5e default is 16 MiB, hence the explicit limit).
_VMEM_BUDGET_BYTES = 16 * 1024 * 1024


def _choose_lane_width(n_elems_per_batch):
    for lane in _LANE_CANDIDATES:
        if n_elems_per_batch % lane == 0:
            return lane
    return None


def _choose_row_tile(n_rows, lane, bytes_per_elem, batch):
    """Row-tile size: big enough to amortize per-step overhead, VMEM-budgeted,
    split-able across two TensorCores when batch == 1, divisor of n_rows if cheap."""
    per_row = 2 * lane * bytes_per_elem            # x2 for double buffering
    max_rows = max(8, _VMEM_BUDGET_BYTES // per_row)
    if max_rows >= n_rows:
        ts = n_rows                                 # full extent is always legal
    else:
        ts = (max_rows // 8) * 8
    # v7x megacore: with a single batch, make sure the seq-tile axis has >= 2 blocks.
    if batch == 1 and ts >= n_rows and n_rows >= 16:
        ts = min(n_rows, (((n_rows + 1) // 2) + 7) // 8 * 8)
    # Prefer a tile that divides n_rows (no ragged masked tail) if it costs < 2x.
    if ts < n_rows and n_rows % ts != 0:
        t = (ts // 8) * 8
        while t >= max(8, ts // 2):
            if n_rows % t == 0:
                ts = t
                break
            t -= 8
    return ts


def positional_encoding_forward(x, pe, dropout_p=0.0, deterministic=True,
                                *, min_pallas_bytes=1 << 20):
    """x: [B, S, d_model]; pe: [max_len, d_model] -> [B, S, d_model] (eval-mode forward)."""
    B, S, D = x.shape
    assert pe.shape[0] >= S and pe.shape[1] == D

    if dropout_p and not deterministic:
        # TODO(synk): training-mode dropout (pltpu.prng_seed / prng_random_bits mask)
        # not implemented; this kernel is the eval-mode forward.
        raise NotImplementedError("training-mode dropout not implemented (eval-mode only)")

    pe_s = pe[:S]  # slice only -- no dtype copy; the f32 cast happens inside the kernel

    # Tiny-input fast path: fixed kernel-launch + pipeline overhead would dominate.
    if x.size * x.dtype.itemsize < min_pallas_bytes:
        return (x.astype(jnp.float32) + pe_s.astype(jnp.float32)[None]).astype(x.dtype)

    # Lane-dense layout: flatten each batch's (S, D) into rows of a wide lane width
    # (pure reshape of contiguous memory; the add is identical, just lane-packed).
    lane = _choose_lane_width(S * D)
    if lane is not None:
        R, L = (S * D) // lane, lane
        x2 = x.reshape(B, R, L)
        pe2 = pe_s.reshape(R, L)
    else:
        R, L = S, D        # fallback: last dim = full d_model (legal block, maybe masked)
        x2, pe2 = x, pe_s

    # Bytes per element across the three streams: x-in + out (x dtype) + pe (its own dtype).
    bytes_per_elem = 2 * x.dtype.itemsize + pe2.dtype.itemsize
    ts = _choose_row_tile(R, L, bytes_per_elem, B)

    # Seq-tiles outermost, batch innermost: the pe block index is constant across the
    # inner batch loop, so Pallas fetches each pe tile once per seq-tile (not per step).
    grid = (pl.cdiv(R, ts), B)

    out2 = pl.pallas_call(
        _add_pe_kernel,
        out_shape=jax.ShapeDtypeStruct((B, R, L), x.dtype),
        grid_spec=pltpu.PrefetchScalarGridSpec(
            num_scalar_prefetch=0,
            grid=grid,
            in_specs=[
                # Batch dim squeezed out of the kernel view -> 2D (ts, L) blocks.
                pl.BlockSpec((None, ts, L), lambda s, b: (b, s, 0)),
                pl.BlockSpec((ts, L), lambda s, b: (s, 0)),
            ],
            out_specs=pl.BlockSpec((None, ts, L), lambda s, b: (b, s, 0)),
        ),
        compiler_params=pltpu.CompilerParams(
            dimension_semantics=("parallel", "parallel"),
            vmem_limit_bytes=32 * 1024 * 1024,
        ),
    )(x2, pe2)

    return out2.reshape(B, S, D)


if __name__ == "__main__":
    max_len, dropout_p = 5000, 0.1
    key = jax.random.PRNGKey(0)
    k1, k2, k3 = jax.random.split(key, 3)

    def ref_forward(x, pe):
        s = x.shape[1]
        return (x.astype(jnp.float32) + pe[:s].astype(jnp.float32)[None]).astype(x.dtype)

    # 1) Module-sized demo shape, forced through the Pallas kernel (packed-lane path).
    B, S, d_model = 2, 8, 32
    pe = sinusoidal_positional_encoding(max_len, d_model)
    x = jax.random.normal(k1, (B, S, d_model), dtype=jnp.float32)
    out = jax.block_until_ready(
        positional_encoding_forward(x, pe, dropout_p=dropout_p, deterministic=True,
                                    min_pallas_bytes=0))
    assert out.shape == (B, S, d_model)
    assert jnp.allclose(out, ref_forward(x, pe), atol=1e-6, rtol=1e-6)

    # 1b) Same shape through the tiny-input fast path (default threshold).
    out_fp = jax.block_until_ready(
        positional_encoding_forward(x, pe, dropout_p=dropout_p, deterministic=True))
    assert jnp.allclose(out_fp, ref_forward(x, pe), atol=1e-6, rtol=1e-6)

    # 2) B == 1: exercises the wide-lane flattening + two-TensorCore seq-tile split.
    B2, S2, d2 = 1, 640, 64
    pe2 = sinusoidal_positional_encoding(1024, d2)
    x2 = jax.random.normal(k2, (B2, S2, d2), dtype=jnp.float32)
    out2 = jax.block_until_ready(
        positional_encoding_forward(x2, pe2, dropout_p=dropout_p, deterministic=True,
                                    min_pallas_bytes=0))
    assert jnp.allclose(out2, ref_forward(x2, pe2), atol=1e-6, rtol=1e-6)

    # 3) S*D not a multiple of 128: exercises the unpacked fallback path.
    B3, S3, d3 = 2, 12, 20
    pe3 = sinusoidal_positional_encoding(64, d3)
    x3 = jax.random.normal(k3, (B3, S3, d3), dtype=jnp.float32)
    out3 = jax.block_until_ready(
        positional_encoding_forward(x3, pe3, dropout_p=dropout_p, deterministic=True,
                                    min_pallas_bytes=0))
    assert jnp.allclose(out3, ref_forward(x3, pe3), atol=1e-6, rtol=1e-6)

    print("KERNEL_OK")
</pallas_src>

<mosaic_0001>
module attributes {stable_mosaic.version = 11 : i64} {
  func.func @_add_pe_kernel(%arg0: i32, %arg1: i32, %arg2: memref<1x1x256xf32, #tpu.memory_space<vmem>>, %arg3: memref<1x256xf32, #tpu.memory_space<vmem>>, %arg4: memref<1x1x256xf32, #tpu.memory_space<vmem>>) attributes {dimension_semantics = [#tpu.dimension_semantics<parallel>, #tpu.dimension_semantics<parallel>], iteration_bounds = array<i64: 1, 2>, scalar_prefetch = 0 : i64, scratch_operands = 0 : i64, tpu.core_type = #tpu.core_type<tc>, window_params = [{transform_indices = @transform_0, window_bounds = array<i64: 1, 1, 256>}, {transform_indices = @transform_1, window_bounds = array<i64: 1, 256>}, {transform_indices = @transform_2, window_bounds = array<i64: 1, 1, 256>}]} {
    %c0 = arith.constant 0 : index
    %c0_0 = arith.constant 0 : index
    %c0_1 = arith.constant 0 : index
    %0 = vector.load %arg2[%c0, %c0_0, %c0_1] : memref<1x1x256xf32, #tpu.memory_space<vmem>>, vector<1x1x256xf32>
    %1 = vector.shape_cast %0 : vector<1x1x256xf32> to vector<1x256xf32>
    %c0_2 = arith.constant 0 : index
    %c0_3 = arith.constant 0 : index
    %2 = vector.load %arg3[%c0_2, %c0_3] : memref<1x256xf32, #tpu.memory_space<vmem>>, vector<1x256xf32>
    %3 = arith.addf %1, %2 : vector<1x256xf32>
    %c0_4 = arith.constant 0 : index
    %c0_5 = arith.constant 0 : index
    %c0_6 = arith.constant 0 : index
    %4 = vector.load %arg4[%c0_4, %c0_5, %c0_6] : memref<1x1x256xf32, #tpu.memory_space<vmem>>, vector<1x1x256xf32>
    %5 = vector.shape_cast %4 : vector<1x1x256xf32> to vector<1x256xf32>
    %6 = vector.shape_cast %3 : vector<1x256xf32> to vector<1x1x256xf32>
    tpu.vector_store %arg4[%c0_4, %c0_5, %c0_6], %6 {strides = array<i32>} : memref<1x1x256xf32, #tpu.memory_space<vmem>>, vector<1x1x256xf32>,
    return
  }
  func.func @transform_0(%arg0: i32, %arg1: i32) -> (i32, i32, i32) {
    %c0_i32 = arith.constant 0 : i32
    %c0_i32_0 = arith.constant 0 : i32
    return %arg1, %arg0, %c0_i32 : i32, i32, i32
  }
  func.func @transform_1(%arg0: i32, %arg1: i32) -> (i32, i32) {
    %c0_i32 = arith.constant 0 : i32
    %c0_i32_0 = arith.constant 0 : i32
    return %arg0, %c0_i32 : i32, i32
  }
  func.func @transform_2(%arg0: i32, %arg1: i32) -> (i32, i32, i32) {
    %c0_i32 = arith.constant 0 : i32
    %c0_i32_0 = arith.constant 0 : i32
    return %arg1, %arg0, %c0_i32 : i32, i32, i32
  }
}

</mosaic_0001>

<bundles_post_ra>
// kernel: tpu_custom_call.1
= control target key start
LH: loop header
LB: loop body
LE: loop exit
PB: predicated region body
PF: predicated region fallthrough
CT: control target
= control target key end

     0   :  { %7 = vsyncpa [#allocation3], 0  ;;  %s722_s0 = inlined_call_operand.hbm [shape: f32[2,1,256], index: 0, kind: input, shape index: {}]   ;;  %s723_s1 = inlined_call_operand.hbm [shape: f32[1,256], index: 1, kind: input, shape index: {}]   ;;  %s724_s2 = inlined_call_operand.hbm [shape: f32[2,1,256], index: 2, kind: output, shape index: {}]  }
   0x1   :  { %9 = vsyncpa [#allocation3 + $0x1], 0 }
   0x2   :  { %10 = vsyncpa [#allocation6], 0 }
   0x3   :  { %11 = vsyncpa [#allocation4], 0 }
   0x4   :  { %13 = vsyncpa [#allocation4 + $0x1], 0  ;;  %s573_s9 = smov 0   ;;  %s575_s10 = smov 0  }
   0x5   :  { %s577_s11 = smov 0   ;;  %s579_s12 = smov 0  }
   0x6   :  { %s581_s13 = smov 0   ;;  %s583_s14 = smov 0  }
   0x7 LB: > { %s321_s15 = sadd.s32 4294967295, %s555_s14   ;;  %s322_s16 = sadd.s32 4294967294, %s555_s14   ;;  %s555_s14 = sphi %s583_s14, %s19_s14   ;;  %s551_s13 = sphi %s581_s13, %s736_s13   ;;  %s547_s12 = sphi %s579_s12, %s735_s12   ;;  %s543_s11 = sphi %s577_s11, %s734_s11   ;;  %s539_s10 = sphi %s575_s10, %s733_s10   ;;  %s535_s9 = sphi %s573_s9, %s732_s9  }
   0x8   : > { %p53_p0 = scmp.ne.s32.totalorder %s539_s10, %s535_s9  ;;  %p607_p1 = scmp.eq.s32.totalorder %s321_s15, 0 }
   0x9   : > { %p611_p2 = scmp.eq.s32.totalorder %s321_s15, 1  ;;  %p111_p3 = scmp.eq.s32.totalorder %s322_s16, 1 }
   0xa   : > { %p617_p4 = por %p607_p1, %p53_p0  ;;  %p323_p5 = scmp.ge.s32.totalorder %s555_s14, 1 }
   0xb   : > { %p622_p6 = por %p111_p3, %p53_p0  ;;  %p118_p7 = scmp.lt.s32.totalorder %s555_s14, 3 }
   0xc   : > { %s132_s23 = sshll.u32 %s723_s1, 4  ;;  %p325_p9 = scmp.ge.s32.totalorder %s555_s14, 2  ;;  %s133_s23 = int_to_ptr.hbm [resolvable:$true] %s132_s23 }
   0xd   : > { %p630_p8 = pnand %p323_p5, %p118_p7  ;;  %s557_s25 = smov [#allocation5]  }
   0xe   : > { %s134_s26 = sshll.u32 %s557_s25, 4  ;;  %s28_s27 = sadd.s32 1, %s551_s13  ;;  %s135_s26 = int_to_ptr.vmem [resolvable:$true] %s134_s26 }
   0xf   : > { %p344_p10 = pneg %p630_p8  ;;  %p29_p12 = scmp.ge.s32.totalorder %s28_s27, 2 }
  0x10   : > { %s40_s28 = sadd.s32 1, %s543_s11  ;;  %p47_p13 = scmp.ne.s32.totalorder %s543_s11, %s539_s10 }
  0x11   : > { %p345_p11 = pnand %p344_p10, %p607_p1  ;;  %p48_p0 = scmp.eq.s32.totalorder %s555_s14, 0 }
  0x12   : > { %s738_s27 = smov (%p29_p12, %s28_s27), 0  ;;  %p652_p5 = por %p611_p2, %p47_p13 }
  0x13   : > { %347 = dma.hbm_to_vmem [thread:$0]  (!%p345_p11), %s133_s23, 32, %s135_s26, [#allocation6]  }
  0x14   : > { %p646_p3 = por %p48_p0, %p47_p13  ;;  %s35_s3 = ssub.s32 %s551_s13, %s738_s27 }
  0x15   : > { %p357_p7 = scmp.lt.s32.totalorder %s555_s14, 2  ;;  %p38_p10 = scmp.eq.s32.totalorder %s35_s3, 0 }
  0x16   : > { %s145_s4 = sand.u32 1, %s543_s11   ;;  %s327_s7 = sshll.u32 %s551_s13, 1 }
  0x17   : > { %s326_s5 = sshll.u32 %s145_s4, 1  ;;  %s155_s16 = scalar_lea.hbm %s722_s0, %s327_s7 }
  0x18   : > { %s661_s6 = scalar_select %p38_p10, %s543_s11, %s40_s28  }
  0x19   : > { %s149_s21 = scalar_lea.vmem [#allocation2], %s326_s5  ;;  %s157_s18 = sshll.u32 %s155_s16, 4  ;;  %s158_s18 = int_to_ptr.hbm [resolvable:$true] %s157_s18 }
  0x1a   : > { %s159_s22 = sshll.u32 %s149_s21, 4  ;;  %p349_p2 = pnand %p357_p7, %p646_p3  ;;  %s160_s22 = int_to_ptr.vmem [resolvable:$true] %s159_s22 }
  0x1b   : > { %s146_s23 = scalar_lea.sflag [#allocation3], %s145_s4  ;;  %168 = sbr.rel (%p630_p8) target bundleno = 50 (0x32), region = 28 }
  0x1c   : > { %351 = dma.hbm_to_vmem [thread:$0]  (!%p349_p2), %s158_s18, 32, %s160_s22, %s146_s23  }
  0x1d   : > { %s672_s25 = sand.u32 (!%p630_p8), 1, %s539_s10  }
  0x1e   : > { %s329_s26 = sshll.u32 (!%p630_p8), %s672_s25, 1  ;;  %s171_s28 = scalar_lea.sflag (!%p630_p8), [#allocation3], %s672_s25 }
  0x1f   : > { %s174_s3 = scalar_lea.vmem (!%p630_p8), [#allocation2], %s329_s26 }
  0x20   : > { %522 = dma.done.wait (%p617_p4), %s171_s28, 32  }
  0x21   : > { %524 = vsyncadd (%p617_p4), %s171_s28, 4294967264 }
  0x22   : > { %526 = dma.done.wait (%p607_p1), [#allocation6], 32  }
  0x23   : > { %528 = vsyncadd (%p607_p1), [#allocation6], 4294967264  ;;  %s333_s24 = sshll.u32 %s547_s12, 1  ;;  %v204_v0 = vlaneseq  ;;  %s200_s7 = scalar_lea.vmem [#allocation7], %s329_s26  ;;  %v201_v1 = vld [vmem:[%s174_s3] sm:$0x3] }
  0x24   : > { %s222_s5 = scalar_lea.hbm %s724_s2, %s333_s24  ;;  %s224_s8 = sshll.u32 %s200_s7, 4  ;;  %v202_v2 = vld [vmem:[#allocation5] sm:$0x3]  ;;  %s225_s8 = int_to_ptr.vmem [resolvable:$true] %s224_s8 }
  0x25   : > { %s226_s15 = sshll.u32 %s222_s5, 4  ;;  %vm206_vm0 = vcmp.lt.s32.totalorder %v204_v0, 256  ;;  %v203_v3 = vadd.f32 %v202_v2, %v201_v1  ;;  %s210_s17 = scalar_lea.sflag [#allocation4], %s672_s25  ;;  %s227_s15 = int_to_ptr.hbm [resolvable:$true] %s226_s15 }
  0x26   : > { %s483_s19 = sshra.s32 %s227_s15, 4  ;;  %s489_s22 = scalar_lea.hbm %s724_s2, 4  ;;  %s484_s19 = int_to_ptr.hbm [resolvable:$true] %s483_s19 }
  0x27   : > { %208 = vst.msk [vmem:[%s200_s7] sm:$0x3] %vm206_vm0, %v203_v3  ;;  %s485_s12 = scalar_lea.hbm %s484_s19, 2  ;;  %p490_p11 = scmp.lt.s32.totalorder %s484_s19, %s724_s2 }
  0x28   : > { %p486_p1 = scmp.ne.s32.totalorder %s484_s19, %s485_s12  ;;  %p491_p12 = scmp.lt.s32.totalorder %s489_s22, %s485_s12 }
  0x2a   : > { %p487_p4 = pnand %p486_p1, %p652_p5  ;;  %p492_p13 = por %p491_p12, %p490_p11 }
  0x2c   : > { %p488_p8 = pneg %p487_p4 }
  0x2e   : > { %p493_p0 = pnand %p492_p13, %p488_p8 }
  0x30   : > { %496 = shalt.err (!%p493_p0)
}
  0x31   : > { %342 = dma.vmem_to_hbm [thread:$0]  (%p652_p5), %s225_s8, 32, %s227_s15, %s210_s17  }
  0x32 PF: > { %s238_s25 = sand.u32 1, %s535_s9   ;;  %p353_p3 = pnand %p325_p9, %p622_p6 }
  0x33   : > { %s239_s26 = scalar_lea.sflag [#allocation4], %s238_s25 }
  0x34   : > { %p354_p7 = pneg %p353_p3 }
  0x36   : > { %530 = dma.done.wait (%p354_p7), %s239_s26, 32  }
  0x37   : > { %532 = vsyncadd (%p354_p7), %s239_s26, 4294967264  ;;  %s19_s14 = sadd.s32 1, %s555_s14   ;;  %s732_s9 = smov %s539_s10 }
  0x38   : > { %p16_p10 = scmp.ge.s32.totalorder %s19_s14, 4   ;;  %s733_s10 = smov %s543_s11 }
  0x39   : > { %s734_s11 = smov %s661_s6  ;;  %s735_s12 = smov %s551_s13 }
  0x3a   : > { %s736_s13 = smov %s738_s27  ;;  %18 = sbr.rel (!%p16_p10) target bundleno = 7 (0x7), region = 78 }
  0x3f   :  { %245 = vsyncpa [#allocation3], 1 }
  0x40   :  { %247 = vsyncpa [#allocation3 + $0x1], 1 }
  0x41   :  { %248 = vsyncpa [#allocation6], 1 }
  0x42   :  { %249 = vsyncpa [#allocation4], 1 }
  0x43   :  { %251 = vsyncpa [#allocation4 + $0x1], 1 }

</bundles_post_ra>
